<compile_context>
chip_gen: v7x
topology: tpu7x:2x2x1
jax: 0.10.0
libtpu: 0.0.40
codegen_flags: <defaults>
</compile_context>

<pallas_src>
import jax
import jax.numpy as jnp
from jax.experimental import pallas as pl
from jax.experimental.pallas import tpu as pltpu


def _swish(x):
    return x * jax.nn.sigmoid(x)


def collective_classifier_kernel(x_ref, w1bd_ref, b1_ref, gate_ref, b2_ref,
                                 expand_ref, fold_ref, o_ref):
    # decode for all agents at once via the block-diagonal weight (lane-packed).
    h = jnp.dot(x_ref[...], w1bd_ref[...],
                preferred_element_type=jnp.float32) + b1_ref[...]      # [tb, A*m]
    preds = _swish(h)                                                  # [tb, A*m]

    # gate_mlp: Swish, then per-agent reduce with w2 baked into gate_ref.
    gates = jnp.dot(_swish(preds), gate_ref[...],
                    preferred_element_type=jnp.float32) + b2_ref[...]  # [tb, A]

    # softmax over agents (dense [tb, A] layout, no trailing-1 dims).
    g = gates - jnp.max(gates, axis=-1, keepdims=True)
    e = jnp.exp(g)
    wts = e / jnp.sum(e, axis=-1, keepdims=True)                       # [tb, A]

    # broadcast each agent weight over its m-lane segment, then fold agents.
    wexp = jnp.dot(wts, expand_ref[...],
                   preferred_element_type=jnp.float32)                 # [tb, A*m]
    out = jnp.dot(preds * wexp, fold_ref[...],
                  preferred_element_type=jnp.float32)                  # [tb, m]
    o_ref[...] = out.astype(o_ref.dtype)


def collective_classifier(agent_outputs, w1, b1, w2, b2, *, tb=None):
    """agent_outputs: [B, A, nm]; w1: [m, nm]; b1: [m]; w2: [1, m]; b2: [1]."""
    B, A, nm = agent_outputs.shape
    m = w1.shape[0]

    # Lane-fold the agent axis: [B, A, nm] -> [B, A*nm] is a free reshape.
    x2 = agent_outputs.reshape(B, A * nm)

    # Batch tile size. Lane-folded input block is tb*A*nm*4 bytes per buffer
    # (4 MiB at tb=4096 for the demo dims), comfortably inside the raised VMEM
    # budget on v5e/v6e/v7x.
    if tb is None:
        tb = min(B, 4096)
        if B > 2048:
            # Keep >= 2 grid steps so ("parallel",) can shard across v7x's TCs.
            tb = min(tb, ((pl.cdiv(B, 2) + 7) // 8) * 8)
    # With more than one grid step the (tb, ...) blocks need tb % 8 == 0.
    if tb < B and tb % 8 != 0:
        tb = ((tb + 7) // 8) * 8
    tb = min(tb, B)
    num_blocks = pl.cdiv(B, tb)

    f32 = jnp.float32
    eye_a = jnp.eye(A, dtype=f32)
    # Block-diagonal decode weight: [A*nm, A*m], block a = w1^T.
    w1bd = jnp.kron(eye_a, jnp.transpose(w1).astype(f32))
    # Tiled decode bias: [1, A*m].
    b1p = jnp.tile(b1.astype(f32).reshape(1, m), (1, A))
    # Gate reduce matrix with w2 baked in: gate_mat[a*m+i, a] = w2[i].
    gate_mat = jnp.kron(eye_a, w2.astype(f32).reshape(m, 1))            # [A*m, A]
    b2r = b2.astype(f32).reshape(1, 1)
    # Weight broadcast / agent fold matrices.
    expand_mat = jnp.kron(eye_a, jnp.ones((1, m), f32))                 # [A, A*m]
    fold_mat = jnp.tile(jnp.eye(m, dtype=f32), (A, 1))                  # [A*m, m]

    return pl.pallas_call(
        collective_classifier_kernel,
        out_shape=jax.ShapeDtypeStruct((B, m), agent_outputs.dtype),
        grid_spec=pl.GridSpec(
            grid=(num_blocks,),
            in_specs=[
                pl.BlockSpec((tb, A * nm), lambda b: (b, 0)),     # x (lane-folded)
                pl.BlockSpec((A * nm, A * m), lambda b: (0, 0)),  # W1 block-diag
                pl.BlockSpec((1, A * m), lambda b: (0, 0)),       # b1 tiled
                pl.BlockSpec((A * m, A), lambda b: (0, 0)),       # gate matrix
                pl.BlockSpec((1, 1), lambda b: (0, 0)),           # b2
                pl.BlockSpec((A, A * m), lambda b: (0, 0)),       # expand matrix
                pl.BlockSpec((A * m, m), lambda b: (0, 0)),       # fold matrix
            ],
            out_specs=pl.BlockSpec((tb, m), lambda b: (b, 0)),
        ),
        compiler_params=pltpu.CompilerParams(
            dimension_semantics=("parallel",),
            vmem_limit_bytes=48 * 1024 * 1024,
        ),
    )(x2, w1bd, b1p, gate_mat, b2r, expand_mat, fold_mat)


def _reference(agent_outputs, w1, b1, w2, b2):
    # Pure-JAX reference mirroring the PyTorch module.
    h = jnp.einsum("ban,mn->bam", agent_outputs, w1) + b1
    preds = _swish(h)
    gates = jnp.einsum("bam,om->bao", _swish(preds), w2) + b2          # [B, A, 1]
    weights = jax.nn.softmax(gates, axis=1)
    return jnp.sum(preds * weights, axis=1)


if __name__ == "__main__":
    # Small shapes consistent with the module's forward:
    #   A=8 agents, agent_outputs_dim (nm)=32, output_dim (m)=16.
    # B=20 with tb=8 exercises the multi-step grid + ragged final block path.
    B, A, NM, M = 20, 8, 32, 16

    key = jax.random.PRNGKey(0)
    kx, kw1, kb1, kw2, kb2 = jax.random.split(key, 5)

    x = jax.random.normal(kx, (B, A, NM), dtype=jnp.float32)

    # Deterministic parameter init (PyTorch Linear shapes: weight [out, in]).
    bound1 = 1.0 / (NM ** 0.5)
    w1 = jax.random.uniform(kw1, (M, NM), jnp.float32, -bound1, bound1)
    b1 = jax.random.uniform(kb1, (M,), jnp.float32, -bound1, bound1)
    bound2 = 1.0 / (M ** 0.5)
    w2 = jax.random.uniform(kw2, (1, M), jnp.float32, -bound2, bound2)
    b2 = jax.random.uniform(kb2, (1,), jnp.float32, -bound2, bound2)

    out = collective_classifier(x, w1, b1, w2, b2, tb=8)
    out = jax.block_until_ready(out)

    ref = _reference(x, w1, b1, w2, b2)
    assert out.shape == (B, M)
    # Tolerance leaves headroom for MXU f32 pass ordering; observed error is
    # far smaller (softmax now uses an exact divide).
    assert jnp.allclose(out, ref, atol=3e-3, rtol=3e-3), "mismatch vs reference"

    print("KERNEL_OK")
</pallas_src>

<mosaic_0001>
module attributes {stable_mosaic.version = 11 : i64} {
  func.func @collective_classifier_kernel(%arg0: i32, %arg1: memref<8x256xf32, #tpu.memory_space<vmem>>, %arg2: memref<256x128xf32, #tpu.memory_space<vmem>>, %arg3: memref<1x128xf32, #tpu.memory_space<vmem>>, %arg4: memref<128x8xf32, #tpu.memory_space<vmem>>, %arg5: memref<1x1xf32, #tpu.memory_space<vmem>>, %arg6: memref<8x128xf32, #tpu.memory_space<vmem>>, %arg7: memref<128x16xf32, #tpu.memory_space<vmem>>, %arg8: memref<8x16xf32, #tpu.memory_space<vmem>>) attributes {dimension_semantics = [#tpu.dimension_semantics<parallel>], iteration_bounds = array<i64: 3>, scalar_prefetch = 0 : i64, scratch_operands = 0 : i64, tpu.core_type = #tpu.core_type<tc>, window_params = [{transform_indices = @transform_0, window_bounds = array<i64: 8, 256>}, {pipeline_mode = #tpu.pipeline_mode<synchronous>, transform_indices = @transform_1, window_bounds = array<i64: 256, 128>}, {pipeline_mode = #tpu.pipeline_mode<synchronous>, transform_indices = @transform_2, window_bounds = array<i64: 1, 128>}, {pipeline_mode = #tpu.pipeline_mode<synchronous>, transform_indices = @transform_3, window_bounds = array<i64: 128, 8>}, {pipeline_mode = #tpu.pipeline_mode<synchronous>, transform_indices = @transform_4, window_bounds = array<i64: 1, 1>}, {pipeline_mode = #tpu.pipeline_mode<synchronous>, transform_indices = @transform_5, window_bounds = array<i64: 8, 128>}, {pipeline_mode = #tpu.pipeline_mode<synchronous>, transform_indices = @transform_6, window_bounds = array<i64: 128, 16>}, {transform_indices = @transform_7, window_bounds = array<i64: 8, 16>}]} {
    %c0 = arith.constant 0 : index
    %c0_0 = arith.constant 0 : index
    %0 = vector.load %arg1[%c0, %c0_0] : memref<8x256xf32, #tpu.memory_space<vmem>>, vector<8x256xf32>
    %c0_1 = arith.constant 0 : index
    %c0_2 = arith.constant 0 : index
    %1 = vector.load %arg2[%c0_1, %c0_2] : memref<256x128xf32, #tpu.memory_space<vmem>>, vector<256x128xf32>
    %cst = arith.constant dense<0.000000e+00> : vector<8x128xf32>
    %2 = tpu.matmul %0, %1, %cst {dimension_numbers = #tpu.dot_dimension_numbers<[1], [0], [0], [1], [0, 0, 1, 1], [], []>} : vector<8x256xf32>, vector<256x128xf32>, vector<8x128xf32> -> vector<8x128xf32>
    %c0_3 = arith.constant 0 : index
    %c0_4 = arith.constant 0 : index
    %3 = vector.load %arg3[%c0_3, %c0_4] : memref<1x128xf32, #tpu.memory_space<vmem>>, vector<1x128xf32>
    %4 = vector.broadcast %3 : vector<1x128xf32> to vector<8x128xf32>
    %5 = arith.addf %2, %4 : vector<8x128xf32>
    %6 = arith.negf %5 : vector<8x128xf32>
    %7 = math.exp %6 : vector<8x128xf32>
    %cst_5 = arith.constant 1.000000e+00 : f32
    %8 = vector.broadcast %cst_5 : f32 to vector<8x128xf32>
    %9 = arith.addf %8, %7 : vector<8x128xf32>
    %10 = arith.divf %8, %9 : vector<8x128xf32>
    %11 = arith.mulf %5, %10 : vector<8x128xf32>
    %12 = arith.negf %11 : vector<8x128xf32>
    %13 = math.exp %12 : vector<8x128xf32>
    %cst_6 = arith.constant 1.000000e+00 : f32
    %14 = vector.broadcast %cst_6 : f32 to vector<8x128xf32>
    %15 = arith.addf %14, %13 : vector<8x128xf32>
    %16 = arith.divf %14, %15 : vector<8x128xf32>
    %17 = arith.mulf %11, %16 : vector<8x128xf32>
    %c0_7 = arith.constant 0 : index
    %c0_8 = arith.constant 0 : index
    %18 = vector.load %arg4[%c0_7, %c0_8] : memref<128x8xf32, #tpu.memory_space<vmem>>, vector<128x8xf32>
    %cst_9 = arith.constant dense<0.000000e+00> : vector<8x8xf32>
    %19 = tpu.matmul %17, %18, %cst_9 {dimension_numbers = #tpu.dot_dimension_numbers<[1], [0], [0], [1], [0, 0, 1, 1], [], []>} : vector<8x128xf32>, vector<128x8xf32>, vector<8x8xf32> -> vector<8x8xf32>
    %c0_10 = arith.constant 0 : index
    %c0_11 = arith.constant 0 : index
    %20 = vector.load %arg5[%c0_10, %c0_11] : memref<1x1xf32, #tpu.memory_space<vmem>>, vector<1x1xf32>
    %21 = vector.broadcast %20 : vector<1x1xf32> to vector<8x8xf32>
    %22 = arith.addf %19, %21 : vector<8x8xf32>
    %cst_12 = arith.constant dense<0xFF800000> : vector<8xf32>
    %23 = vector.multi_reduction <maximumf>, %22, %cst_12 [1] : vector<8x8xf32> to vector<8xf32>
    %24 = vector.shape_cast %23 : vector<8xf32> to vector<8x1xf32>
    %25 = vector.broadcast %24 : vector<8x1xf32> to vector<8x8xf32>
    %26 = arith.subf %22, %25 : vector<8x8xf32>
    %27 = math.exp %26 : vector<8x8xf32>
    %cst_13 = arith.constant dense<0.000000e+00> : vector<8xf32>
    %28 = vector.multi_reduction <add>, %27, %cst_13 [1] : vector<8x8xf32> to vector<8xf32>
    %29 = vector.shape_cast %28 : vector<8xf32> to vector<8x1xf32>
    %30 = vector.broadcast %29 : vector<8x1xf32> to vector<8x8xf32>
    %31 = arith.divf %27, %30 : vector<8x8xf32>
    %c0_14 = arith.constant 0 : index
    %c0_15 = arith.constant 0 : index
    %32 = vector.load %arg6[%c0_14, %c0_15] : memref<8x128xf32, #tpu.memory_space<vmem>>, vector<8x128xf32>
    %cst_16 = arith.constant dense<0.000000e+00> : vector<8x128xf32>
    %33 = tpu.matmul %31, %32, %cst_16 {dimension_numbers = #tpu.dot_dimension_numbers<[1], [0], [0], [1], [0, 0, 1, 1], [], []>} : vector<8x8xf32>, vector<8x128xf32>, vector<8x128xf32> -> vector<8x128xf32>
    %34 = arith.mulf %11, %33 : vector<8x128xf32>
    %c0_17 = arith.constant 0 : index
    %c0_18 = arith.constant 0 : index
    %35 = vector.load %arg7[%c0_17, %c0_18] : memref<128x16xf32, #tpu.memory_space<vmem>>, vector<128x16xf32>
    %cst_19 = arith.constant dense<0.000000e+00> : vector<8x16xf32>
    %36 = tpu.matmul %34, %35, %cst_19 {dimension_numbers = #tpu.dot_dimension_numbers<[1], [0], [0], [1], [0, 0, 1, 1], [], []>} : vector<8x128xf32>, vector<128x16xf32>, vector<8x16xf32> -> vector<8x16xf32>
    %c0_20 = arith.constant 0 : index
    %c0_21 = arith.constant 0 : index
    %37 = vector.load %arg8[%c0_20, %c0_21] : memref<8x16xf32, #tpu.memory_space<vmem>>, vector<8x16xf32>
    tpu.vector_store %arg8[%c0_20, %c0_21], %36 {strides = array<i32>} : memref<8x16xf32, #tpu.memory_space<vmem>>, vector<8x16xf32>,
    return
  }
  func.func @transform_0(%arg0: i32) -> (i32, i32) {
    %c0_i32 = arith.constant 0 : i32
    %c0_i32_0 = arith.constant 0 : i32
    return %arg0, %c0_i32 : i32, i32
  }
  func.func @transform_1(%arg0: i32) -> (i32, i32) {
    %c0_i32 = arith.constant 0 : i32
    %c0_i32_0 = arith.constant 0 : i32
    %c0_i32_1 = arith.constant 0 : i32
    return %c0_i32, %c0_i32_0 : i32, i32
  }
  func.func @transform_2(%arg0: i32) -> (i32, i32) {
    %c0_i32 = arith.constant 0 : i32
    %c0_i32_0 = arith.constant 0 : i32
    %c0_i32_1 = arith.constant 0 : i32
    return %c0_i32, %c0_i32_0 : i32, i32
  }
  func.func @transform_3(%arg0: i32) -> (i32, i32) {
    %c0_i32 = arith.constant 0 : i32
    %c0_i32_0 = arith.constant 0 : i32
    %c0_i32_1 = arith.constant 0 : i32
    return %c0_i32, %c0_i32_0 : i32, i32
  }
  func.func @transform_4(%arg0: i32) -> (i32, i32) {
    %c0_i32 = arith.constant 0 : i32
    %c0_i32_0 = arith.constant 0 : i32
    %c0_i32_1 = arith.constant 0 : i32
    return %c0_i32, %c0_i32_0 : i32, i32
  }
  func.func @transform_5(%arg0: i32) -> (i32, i32) {
    %c0_i32 = arith.constant 0 : i32
    %c0_i32_0 = arith.constant 0 : i32
    %c0_i32_1 = arith.constant 0 : i32
    return %c0_i32, %c0_i32_0 : i32, i32
  }
  func.func @transform_6(%arg0: i32) -> (i32, i32) {
    %c0_i32 = arith.constant 0 : i32
    %c0_i32_0 = arith.constant 0 : i32
    %c0_i32_1 = arith.constant 0 : i32
    return %c0_i32, %c0_i32_0 : i32, i32
  }
  func.func @transform_7(%arg0: i32) -> (i32, i32) {
    %c0_i32 = arith.constant 0 : i32
    %c0_i32_0 = arith.constant 0 : i32
    return %arg0, %c0_i32 : i32, i32
  }
}

</mosaic_0001>

<bundles_post_ra>
// kernel: tpu_custom_call.1
= control target key start
LH: loop header
LB: loop body
LE: loop exit
PB: predicated region body
PF: predicated region fallthrough
CT: control target
= control target key end

     0   :  { %s1510_s0 = inlined_call_operand.hbm [shape: f32[20,256], index: 0, kind: input, shape index: {}]   ;;  %s1511_s1 = inlined_call_operand.vmem [shape: f32[256,128], index: 1, kind: input, shape index: {}]   ;;  %s1512_s2 = inlined_call_operand.vmem [shape: f32[1,128], index: 2, kind: input, shape index: {}]   ;;  %s1513_s3 = inlined_call_operand.vmem [shape: f32[128,8], index: 3, kind: input, shape index: {}]   ;;  %s1514_s4 = inlined_call_operand.<no memory space> [shape: f32[1,1], index: 4, kind: input, shape index: {}]   ;;  %s1515_s5 = inlined_call_operand.vmem [shape: f32[8,128], index: 5, kind: input, shape index: {}]   ;;  %s1516_s6 = inlined_call_operand.vmem [shape: f32[128,16], index: 6, kind: input, shape index: {}]   ;;  %s1517_s7 = inlined_call_operand.vmem [shape: f32[20,16], index: 7, kind: output, shape index: {}]  }
   0x1   :  { %v12_v0 = vstv %s1514_s4 }
   0x2   :  { %13 = vst [vmem:[#allocation2] sm:$0x1] %v12_v0 }
   0x3   :  { %14 = vsyncpa [#allocation4], 0 }
   0x4   :  { %16 = vsyncpa [#allocation4 + $0x1], 0  ;;  %s1171_s26 = smov 0   ;;  %s1173_s27 = smov 0  }
   0x5   :  { %s1175_s28 = smov 0   ;;  %s1177_s29 = smov 0  }
   0x6 LB: > { %s1190_s4 = sadd.s32 4294967295, %s1121_s29   ;;  %s1193_s30 = sadd.s32 1, %s1121_s29   ;;  %s1121_s29 = sphi %s1177_s29, %s1525_s29   ;;  %s1117_s28 = sphi %s1175_s28, %s1524_s28   ;;  %s1113_s27 = sphi %s1173_s27, %s1523_s27   ;;  %s1109_s26 = sphi %s1171_s26, %s1522_s26  }
   0x7   : > { %s26_s8 = ssub.s32 %s1121_s29, %s1193_s30  ;;  %s29_s9 = sadd.s32 1, %s1117_s28 }
   0x8   : > { %p27_p0 = scmp.eq.s32.totalorder %s26_s8, 0  ;;  %p36_p1 = scmp.ne.s32.totalorder %s1117_s28, %s1113_s27 }
   0x9   : > { %p37_p2 = scmp.eq.s32.totalorder %s1121_s29, 0  ;;  %p42_p3 = scmp.ne.s32.totalorder %s1113_s27, %s1109_s26 }
   0xa   : > { %s1203_s10 = scalar_select %p27_p0, %s1117_s28, %s29_s9  }
   0xb   : > { %p38_p4 = por %p37_p2, %p36_p1  ;;  %p43_p5 = scmp.eq.s32.totalorder %s1190_s4, 0 }
   0xc   : > { %p1007_p6 = scmp.lt.s32.totalorder %s1121_s29, 3  ;;  %s236_s12 = sand.u32 1, %s1117_s28  }
   0xd   : > { %p1207_p7 = por %p43_p5, %p42_p3  ;;  %s761_s13 = sshll.u32 %s236_s12, 4 }
   0xe   : > { %s774_s14 = sshll.u32 %s1121_s29, 8  ;;  %s240_s18 = scalar_lea.vmem [#allocation3], %s761_s13 }
   0xf   : > { %s1216_s17 = scalar_lea.hbm %s1510_s0, %s774_s14  ;;  %s248_s19 = sshll.u32 %s240_s18, 4  ;;  %s1218_s19 = int_to_ptr.vmem [resolvable:$true] %s248_s19 }
  0x10   : > { %p1220_p8 = pnand %p1007_p6, %p38_p4  ;;  %s237_s21 = scalar_lea.sflag [#allocation4], %s236_s12 }
  0x11   : > { %s1057_s22 = scalar_lea.hbm %s1216_s17, 256  ;;  %s1062_s25 = scalar_lea.hbm %s1510_s0, 768 }
  0x12   : > { %p1058_p11 = scmp.ne.s32.totalorder %s1216_s17, %s1057_s22  ;;  %p1059_p12 = pneg %p1220_p8 }
  0x13   : > { %p1063_p1 = scmp.lt.u32.totalorder %s1216_s17, %s1510_s0  ;;  %p1064_p2 = scmp.lt.u32.totalorder %s1062_s25, %s1057_s22 }
  0x14   : > { %p1060_p13 = pnand %p1059_p12, %p1058_p11  ;;  %p1066_p4 = scmp.lt.u32.totalorder %s1057_s22, %s1216_s17 }
  0x15   : > { %p1065_p3 = por %p1064_p2, %p1063_p1 }
  0x16   : > { %p1061_p0 = pneg %p1060_p13 }
  0x17   : > { %p1067_p5 = por %p1066_p4, %p1065_p3 }
  0x19   : > { %p1068_p6 = pnand %p1067_p5, %p1061_p0 }
  0x1b   : > { %1071 = shalt.err (!%p1068_p6)
}
  0x1c   : > { %s1072_s9 = scalar_lea.vmem %s1218_s19, 256  ;;  %s1123_s12 = smov [#allocation3]  }
  0x1d   : > { %p1073_p11 = scmp.ne.s32.totalorder %s1218_s19, %s1072_s9  ;;  %s1077_s13 = sshll.u32 %s1123_s12, 4  ;;  %s1078_s13 = int_to_ptr.vmem [resolvable:$false] %s1077_s13 }
  0x1e   : > { %s1079_s14 = scalar_lea.vmem %s1078_s13, 512  ;;  %p1080_p10 = scmp.lt.s32.totalorder %s1218_s19, %s1078_s13 }
  0x1f   : > { %p1075_p13 = pnand %p1073_p11, %p1059_p12  ;;  %p1081_p1 = scmp.lt.s32.totalorder %s1079_s14, %s1072_s9 }
  0x21   : > { %p1076_p9 = pneg %p1075_p13  ;;  %p1082_p2 = por %p1081_p1, %p1080_p10 }
  0x23   : > { %p1083_p3 = pnand %p1082_p2, %p1076_p9 }
  0x25   : > { %1086 = shalt.err (!%p1083_p3)
}
  0x26   : > { %1006 = dma.hbm_to_vmem [thread:$0]  (!%p1220_p8), %s1216_s17, 256, %s1218_s19, %s237_s21  }
  0x27   : > { %p1520_p0 = scmp.lt.s32.totalorder %s1121_s29, 4  ;;  %p1521_p4 = scmp.ge.s32.totalorder %s1121_s29, 1 }
  0x29   : > { %p254_p12 = pnand %p1521_p4, %p1520_p0 }
  0x2a   : > { %s259_s15 = sand.u32 (!%p254_p12), 1, %s1113_s27  }
  0x2b   : > { %257 = sbr.rel (%p254_p12) target bundleno = 1314 (0x522), region = 48  ;;  %s1256_s16 = sshll.u32 (!%p254_p12), %s259_s15, 4 }
  0x2c   : > { %s260_s18 = scalar_lea.sflag (!%p254_p12), [#allocation4], %s259_s15  ;;  %s263_s22 = scalar_lea.vmem (!%p254_p12), [#allocation3], %s1256_s16 }
  0x32   : > { %1104 = dma.done.wait (%p1207_p7), %s260_s18, 256  }
  0x33   : > { %1106 = vsyncadd (%p1207_p7), %s260_s18, 4294967040  ;;  %v315_v1 = vld [vmem:[%s1511_s1 + $0x80] sm:$0xff]  ;;  %v316_v2 = vld [vmem:[%s1511_s1 + $0x88] sm:$0xff]  ;;  %v1124_v54 = vmov 0.0|0.0   ;;  %vm1125_vm0 = vmmov 0   ;;  %vm518_vm1 = vcmask 64512  }
  0x34   : > { %v299_v3 = vld [vmem:[%s1511_s1] sm:$0xff]  ;;  %v921_v4 = vpack.c.bf16 %v316_v2, %v315_v1  ;;  %v300_v5 = vld [vmem:[%s1511_s1 + $0x8] sm:$0xff]  ;;  %v317_v6 = vld [vmem:[%s1511_s1 + $0x90] sm:$0xff]  ;;  %953 = vmatprep.subr.bf16.mxu1 %v1124_v54  ;;  %p293_p7 = scmp.lt.s32.totalorder %s1190_s4, 2  ;;  %vm691_vm2 = vcmask 130048  }
  0x35   : > { %v318_v7 = vld [vmem:[%s1511_s1 + $0x98] sm:$0xff]  ;;  %v923_v8 = vpack.c.bf16 %v300_v5, %v299_v3  ;;  %v301_v10 = vld [vmem:[%s1511_s1 + $0x10] sm:$0xff]  ;;  %v319_v12 = vld [vmem:[%s1511_s1 + $0xa0] sm:$0xff] }
  0x36   : > { %v925_v9 = vpack.c.bf16 %v318_v7, %v317_v6  ;;  %v302_v11 = vld [vmem:[%s1511_s1 + $0x18] sm:$0xff]  ;;  %922 = vmatprep.subr.bf16.mxu0 %v921_v4  ;;  %v320_v13 = vld [vmem:[%s1511_s1 + $0xa8] sm:$0xff]  ;;  %v303_v16 = vld [vmem:[%s1511_s1 + $0x20] sm:$0xff]  ;;  %s1527_s4 = smov (!%p293_p7, %s1190_s4), 2 }
  0x37   : > { %924 = vmatpush3.bf16.msra.mxu0 %v923_v8  ;;  %v927_v14 = vpack.c.bf16 %v302_v11, %v301_v10  ;;  %v929_v15 = vpack.c.bf16 %v320_v13, %v319_v12  ;;  %v304_v17 = vld [vmem:[%s1511_s1 + $0x28] sm:$0xff]  ;;  %v321_v18 = vld [vmem:[%s1511_s1 + $0xb0] sm:$0xff]  ;;  %v322_v19 = vld [vmem:[%s1511_s1 + $0xb8] sm:$0xff]  ;;  %v1126_v8 = vmov 0.0   ;;  %s766_s21 = sshll.u32 %s1527_s4, 3 }
  0x38   : > { %926 = vmatprep.subr.bf16.mxu0 %v925_v9  ;;  %v931_v20 = vpack.c.bf16 %v304_v17, %v303_v16  ;;  %v933_v21 = vpack.c.bf16 %v322_v19, %v321_v18  ;;  %v305_v22 = vld [vmem:[%s1511_s1 + $0x30] sm:$0xff]  ;;  %v306_v23 = vld [vmem:[%s1511_s1 + $0x38] sm:$0xff]  ;;  %v323_v24 = vld [vmem:[%s1511_s1 + $0xc0] sm:$0xff]  ;;  %878 = vmatprep.mubr.msk.f32.mxu1 %vm1125_vm0, %v1126_v8  ;;  %s296_s26 = scalar_lea.vmem %s1517_s7, %s766_s21 }
  0x39   : > { %v324_v25 = vld [vmem:[%s1511_s1 + $0xc8] sm:$0xff]  ;;  %v935_v27 = vpack.c.bf16 %v306_v23, %v305_v22  ;;  %v307_v29 = vld [vmem:[%s1511_s1 + $0x40] sm:$0xff]  ;;  %v325_v31 = vld [vmem:[%s1511_s1 + $0xd0] sm:$0xff] }
  0x3a   : > { %v298_v26 = vld [vmem:[%s263_s22 + $0x8] sm:$0xff]  ;;  %v937_v28 = vpack.c.bf16 %v324_v25, %v323_v24  ;;  %v297_v50 = vld [vmem:[%s263_s22] sm:$0xff] }
  0x3b   : > { %928 = vmatpush3.bf16.msra.mxu0 %v927_v14  ;;  %402 = vmatprep.mubr.f32.mxu0 %v298_v26  ;;  %v308_v30 = vld [vmem:[%s1511_s1 + $0x48] sm:$0xff]  ;;  %v326_v32 = vld [vmem:[%s1511_s1 + $0xd8] sm:$0xff]  ;;  %v309_v35 = vld [vmem:[%s1511_s1 + $0x50] sm:$0xff]  ;;  %v1127_v14 = vmov 0  }
  0x3c   : > { %930 = vmatprep.subr.bf16.mxu0 %v929_v15  ;;  %v939_v33 = vpack.c.bf16 %v308_v30, %v307_v29  ;;  %v941_v34 = vpack.c.bf16 %v326_v32, %v325_v31  ;;  %v310_v36 = vld [vmem:[%s1511_s1 + $0x58] sm:$0xff]  ;;  %v327_v37 = vld [vmem:[%s1511_s1 + $0xe0] sm:$0xff]  ;;  %v328_v38 = vld [vmem:[%s1511_s1 + $0xe8] sm:$0xff]  ;;  %1044 = vset.pattern.permute.xlu0 %v1127_v14 }
  0x3d   : > { %v943_v39 = vpack.c.bf16 %v310_v36, %v309_v35  ;;  %v945_v40 = vpack.c.bf16 %v328_v38, %v327_v37  ;;  %v311_v41 = vld [vmem:[%s1511_s1 + $0x60] sm:$0xff]  ;;  %v312_v42 = vld [vmem:[%s1511_s1 + $0x68] sm:$0xff]  ;;  %v329_v43 = vld [vmem:[%s1511_s1 + $0xf0] sm:$0xff] }
  0x3e   : > { %v330_v44 = vld [vmem:[%s1511_s1 + $0xf8] sm:$0xff]  ;;  %v947_v45 = vpack.c.bf16 %v312_v42, %v311_v41  ;;  %v313_v47 = vld [vmem:[%s1511_s1 + $0x70] sm:$0xff]  ;;  %v422_v51 = vld [vmem:[%s1513_s3] sm:$0xff] }
  0x3f   : > { %932 = vmatpush3.bf16.msra.mxu0 %v931_v20  ;;  %v949_v46 = vpack.c.bf16 %v330_v44, %v329_v43  ;;  %v314_v48 = vld [vmem:[%s1511_s1 + $0x78] sm:$0xff]  ;;  %v423_v52 = vld [vmem:[%s1513_s3 + $0x8] sm:$0xff]  ;;  %v424_v55 = vld [vmem:[%s1513_s3 + $0x10] sm:$0xff] }
  0x40   : > { %934 = vmatprep.subr.bf16.mxu0 %v933_v21  ;;  %v951_v49 = vpack.c.bf16 %v314_v48, %v313_v47  ;;  %v954_v53 = vpack.c.bf16 %v423_v52, %v422_v51  ;;  %v425_v56 = vld [vmem:[%s1513_s3 + $0x18] sm:$0xff]  ;;  %v426_v58 = vld [vmem:[%s1513_s3 + $0x20] sm:$0xff]  ;;  %v427_v59 = vld [vmem:[%s1513_s3 + $0x28] sm:$0xff] }
  0x41   : > { %v957_v57 = vpack.c.bf16 %v425_v56, %v424_v55  ;;  %v960_v60 = vpack.c.bf16 %v427_v59, %v426_v58  ;;  %v428_v61 = vld [vmem:[%s1513_s3 + $0x30] sm:$0xff]  ;;  %v429_v62 = vld [vmem:[%s1513_s3 + $0x38] sm:$0xff]  ;;  %v430_v0 = vld [vmem:[%s1513_s3 + $0x40] sm:$0xff] }
  0x42   : > { %955 = vmatpush3.bf16.msra.mxu1 %v954_v53  ;;  %v963_v63 = vpack.c.bf16 %v429_v62, %v428_v61  ;;  %v431_v1 = vld [vmem:[%s1513_s3 + $0x48] sm:$0xff]  ;;  %v432_v3 = vld [vmem:[%s1513_s3 + $0x50] sm:$0xff]  ;;  %v433_v4 = vld [vmem:[%s1513_s3 + $0x58] sm:$0xff] }
  0x43   : > { %936 = vmatpush3.bf16.msra.mxu0 %v935_v27  ;;  %956 = vmatprep.subr.bf16.mxu1 %v1124_v54  ;;  %v966_v2 = vpack.c.bf16 %v431_v1, %v430_v0  ;;  %v969_v5 = vpack.c.bf16 %v433_v4, %v432_v3  ;;  %v434_v6 = vld [vmem:[%s1513_s3 + $0x60] sm:$0xff]  ;;  %v435_v7 = vld [vmem:[%s1513_s3 + $0x68] sm:$0xff]  ;;  %v436_v10 = vld [vmem:[%s1513_s3 + $0x70] sm:$0xff] }
  0x44   : > { %938 = vmatprep.subr.bf16.mxu0 %v937_v28  ;;  %v972_v9 = vpack.c.bf16 %v435_v7, %v434_v6  ;;  %v437_v11 = vld [vmem:[%s1513_s3 + $0x78] sm:$0xff]  ;;  %v770_v13 = vld [vmem:[#allocation2] ss:$0 sm:$0xff]  ;;  %v606_v42 = vld [vmem:[%s1516_s6 + $0x8] sm:$0xff] }
  0x45   : > { %v975_v12 = vpack.c.bf16 %v437_v11, %v436_v10  ;;  %445 = vperm.xlu0 %1044, %v770_v13   ;;  %v767_v16 = vld [vmem:[%s1512_s2] ss:$0 sm:$0xff]  ;;  %v607_v43 = vld [vmem:[%s1516_s6 + $0x10] sm:$0xff]  ;;  %v610_v48 = vld [vmem:[%s1516_s6 + $0x28] sm:$0xff] }
  0x46   : > { %958 = vmatpush3.bf16.msra.mxu1 %v957_v57  ;;  %v605_v41 = vld [vmem:[%s1516_s6] sm:$0xff]  ;;  %v612_v51 = vld [vmem:[%s1516_s6 + $0x38] sm:$0xff]  ;;  %v614_v55 = vld [vmem:[%s1516_s6 + $0x48] sm:$0xff] }
  0x47   : > { %940 = vmatpush3.bf16.msra.mxu0 %v939_v33  ;;  %959 = vmatprep.subr.bf16.mxu1 %v1124_v54  ;;  %v978_v44 = vpack.c.bf16 %v606_v42, %v605_v41  ;;  %v609_v47 = vld [vmem:[%s1516_s6 + $0x20] sm:$0xff]  ;;  %v615_v57 = vld [vmem:[%s1516_s6 + $0x50] sm:$0xff]  ;;  %v616_v58 = vld [vmem:[%s1516_s6 + $0x58] sm:$0xff] }
  0x48   : > { %942 = vmatprep.subr.bf16.mxu0 %v941_v34  ;;  %v613_v53 = vld [vmem:[%s1516_s6 + $0x40] sm:$0xff]  ;;  %v993_v59 = vpack.c.bf16 %v616_v58, %v615_v57  ;;  %v618_v61 = vld [vmem:[%s1516_s6 + $0x68] sm:$0xff]  ;;  %v620_v3 = vld [vmem:[%s1516_s6 + $0x78] sm:$0xff] }
  0x49   : > { %v990_v56 = vpack.c.bf16 %v614_v55, %v613_v53 }
  0x4a   : > { %961 = vmatpush3.bf16.msra.mxu1 %v960_v60  ;;  %v617_v60 = vld [vmem:[%s1516_s6 + $0x60] sm:$0xff] }
  0x4b   : > { %944 = vmatpush3.bf16.msra.mxu0 %v943_v39  ;;  %962 = vmatprep.subr.bf16.mxu1 %v1124_v54  ;;  %v996_v62 = vpack.c.bf16 %v618_v61, %v617_v60 }
  0x4c   : > { %946 = vmatprep.subr.bf16.mxu0 %v945_v40  ;;  %v530_v40 = vld [vmem:[%s1515_s5] sm:$0xff] }
  0x4e   : > { %964 = vmatpush3.bf16.msra.mxu1 %v963_v63 }
  0x4f   : > { %948 = vmatpush3.bf16.msra.mxu0 %v947_v45  ;;  %965 = vmatprep.subr.bf16.mxu1 %v1124_v54  ;;  %v608_v45 = vld [vmem:[%s1516_s6 + $0x18] sm:$0xff] }
  0x50   : > { %950 = vmatprep.subr.bf16.mxu0 %v949_v46  ;;  %v981_v46 = vpack.c.bf16 %v608_v45, %v607_v43 }
  0x52   : > { %967 = vmatpush3.bf16.msra.mxu1 %v966_v2  ;;  %v619_v2 = vld [vmem:[%s1516_s6 + $0x70] sm:$0xff] }
  0x53   : > { %952 = vmatpush3.bf16.msra.mxu0 %v951_v49  ;;  %968 = vmatprep.subr.bf16.mxu1 %v1124_v54  ;;  %v984_v49 = vpack.c.bf16 %v610_v48, %v609_v47  ;;  %v999_v4 = vpack.c.bf16 %v620_v3, %v619_v2 }
  0x54   : > { %881 = vmatprep.subr.mxu0 %v1126_v8 }
  0x56   : > { %403 = vmatmul.mubr.f32.vlgmr.msra.gmra.mrb[0].mxu0 %v297_v50  ;;  %970 = vmatpush3.bf16.msra.mxu1 %v969_v5  ;;  %v611_v50 = vld [vmem:[%s1516_s6 + $0x30] sm:$0xff] }
  0x57   : > { %883 = vmatprep.mubr.msk.f32.mxu0 %vm1125_vm0, %v1126_v8  ;;  %971 = vmatprep.subr.bf16.mxu1 %v1124_v54  ;;  %v987_v52 = vpack.c.bf16 %v612_v51, %v611_v50 }
  0x58   : > { %882 = vmatpush3.msra.mxu0 %v530_v40 }
  0x5a   : > { %973 = vmatpush3.bf16.msra.mxu1 %v972_v9 }
  0x5b   : > { %974 = vmatprep.subr.bf16.mxu1 %v1124_v54 }
  0x5e   : > { %976 = vmatpush3.bf16.msra.mxu1 %v975_v12 }
  0x5f   : > { %977 = vmatprep.subr.bf16.mxu1 %v1124_v54 }
  0xc4   : > { %v446_v30 = vpop.permute.xlu0 %445 }
 0x129   : > { %v807_v15 = vpop.f32.mrb[0].mxu0 }
 0x12a   : > { %v808_v17 = vpop.f32.mrb[1].mxu0 }
 0x12b   : > { %v809_v18 = vadd.f32 %v808_v17, %v807_v15 }
 0x12d   : > { %v405_v19 = vadd.f32 %v809_v18, %v767_v16 }
 0x12f   : > { %v768_v20 = vmul.f32 -1.442695, %v405_v19 }
 0x131   : > { %1045 = vpow2.f32 %v768_v20 }
 0x13b   : > { %v1046_v21 = vpop.eup %1045 }
 0x13c   : > { %v411_v22 = vadd.f32 1.0, %v1046_v21 }
 0x13e   : > { %1047 = vrcp.f32 %v411_v22 }
 0x148   : > { %v1048_v23 = vpop.eup %1047 }
 0x149   : > { %v1425_v24 = vmul.f32 %v1048_v23, %v405_v19 }
 0x14b   : > { %v769_v25 = vmul.f32 -1.442695, %v1425_v24 }
 0x14d   : > { %1049 = vpow2.f32 %v769_v25 }
 0x157   : > { %v1050_v26 = vpop.eup %1049 }
 0x158   : > { %v418_v27 = vadd.f32 1.0, %v1050_v26 }
 0x15a   : > { %1051 = vrcp.f32 %v418_v27 }
 0x164   : > { %v1052_v28 = vpop.eup %1051 }
 0x165   : > { %v421_v29 = vmul.f32 %v1052_v28, %v1425_v24 }
 0x167   : > { %879 = vmatmul.mubr.f32.vlgmr.msra.gmra.mrb[0].mxu1 %v421_v29 }
 0x168   : > { %918 = vmatprep.mubr.msk.f32.mxu1 %vm1125_vm0, %v1126_v8  ;;  %979 = vmatpush3.bf16.msra.mxu1 %v978_v44 }
 0x169   : > { %980 = vmatprep.subr.bf16.mxu1 %v1124_v54 }
 0x16c   : > { %982 = vmatpush3.bf16.msra.mxu1 %v981_v46 }
 0x16d   : > { %983 = vmatprep.subr.bf16.mxu1 %v1124_v54 }
 0x170   : > { %985 = vmatpush3.bf16.msra.mxu1 %v984_v49 }
 0x171   : > { %986 = vmatprep.subr.bf16.mxu1 %v1124_v54 }
 0x174   : > { %988 = vmatpush3.bf16.msra.mxu1 %v987_v52 }
 0x175   : > { %989 = vmatprep.subr.bf16.mxu1 %v1124_v54 }
 0x178   : > { %991 = vmatpush3.bf16.msra.mxu1 %v990_v56 }
 0x179   : > { %992 = vmatprep.subr.bf16.mxu1 %v1124_v54 }
 0x17c   : > { %994 = vmatpush3.bf16.msra.mxu1 %v993_v59 }
 0x17d   : > { %995 = vmatprep.subr.bf16.mxu1 %v1124_v54 }
 0x180   : > { %997 = vmatpush3.bf16.msra.mxu1 %v996_v62 }
 0x181   : > { %998 = vmatprep.subr.bf16.mxu1 %v1124_v54 }
 0x184   : > { %1000 = vmatpush3.bf16.msra.mxu1 %v999_v4 }
 0x23a   : > { %v514_v31 = vpop.f32.mrb[0].mxu1 }
 0x23b   : > { %v515_v32 = vadd.f32 %v514_v31, %v446_v30  ;;  %v880_v33 = vpop.f32.mrb[1].mxu1 }
 0x23d   : > { %v519_v34 = vsel %vm518_vm1, %v515_v32, -inf }
 0x23e   : > { %520 = vmax.xlane.f32.xlu0 %v519_v34 }
 0x2cb   : > { %v521_v35 = vpop.xlane.xlu0 %520 }
 0x2cc   : > { %v522_v36 = vsub.f32 %v515_v32, %v521_v35 }
 0x2ce   : > { %v523_v37 = vmul.f32 1.442695, %v522_v36 }
 0x2d0   : > { %1053 = vpow2.f32 %v523_v37 }
 0x2da   : > { %v1054_v38 = vpop.eup %1053 }
 0x2db   : > { %v525_v39 = vsel %vm518_vm1, %v1054_v38, 0.0 }
 0x2dc   : > { %526 = vadd.xlane.f32.xlu1 %v525_v39 }
 0x369   : > { %v527_v63 = vpop.xlane.xlu1 %526 }
 0x36a   : > { %1055 = vrcp.f32 %v527_v63 }
 0x374   : > { %v1056_v0 = vpop.eup %1055 }
 0x375   : > { %v529_v1 = vmul.f32 %v1056_v0, %v1054_v38 }
 0x377   : > { %884 = vmatmul.mubr.msk.f32.vlgmr.msra.gmra.mrb[2].mxu0 %vm518_vm1, %v529_v1 }
 0x44a   : > { %v600_v5 = vpop.f32.mrb[2].mxu0 }
 0x44b   : > { %v604_v6 = vmul.f32 %v600_v5, %v1425_v24  ;;  %v885_v54 = vpop.f32.mrb[3].mxu0 }
 0x44d   : > { %919 = vmatmul.mubr.f32.vlgmr.msra.gmra.mrb[2].mxu1 %v604_v6 }
 0x520   : > { %v687_v7 = vpop.f32.mrb[2].mxu1 }
 0x521   : > { %692 = vst.msk [vmem:[%s296_s26] sm:$0xff] %vm691_vm2, %v687_v7  ;;  %v920_v8 = vpop.f32.mrb[3].mxu1 }
 0x522 PF: > { %p19_p8 = scmp.ge.s32.totalorder %s1193_s30, 5   ;;  %s1522_s26 = smov %s1113_s27 }
 0x523   : > { %s1523_s27 = smov %s1117_s28  ;;  %s1524_s28 = smov %s1203_s10 }
 0x524   : > { %s1525_s29 = smov %s1193_s30  ;;  %21 = sbr.rel (!%p19_p8) target bundleno = 6 (0x6), region = 88 }
 0x52b   :  { %712 = vsyncpa [#allocation4], 1 }
 0x52c   :  { %714 = vsyncpa [#allocation4 + $0x1], 1 }

</bundles_post_ra>
